<compile_context>
chip_gen: v7x
topology: tpu7x:2x2x1
jax: 0.10.0
libtpu: 0.0.40
codegen_flags: <defaults>
</compile_context>

<pallas_src>
import jax
import jax.numpy as jnp
from jax.experimental import pallas as pl
from jax.experimental.pallas import tpu as pltpu


def _mish_kernel(x_ref, o_ref):
    x = x_ref[...].astype(jnp.float32)
    # mish(x) = x * tanh(softplus(x)).  With s = softplus(x), e^s = 1 + e^x:
    #   tanh(s) = (e^{2s} - 1) / (e^{2s} + 1) = p / (p + 2),  p = e^x * (e^x + 2)
    # Clamp at 20 (matches F.softplus threshold=20); for x > 20 the ratio is
    # exactly 1.0 in f32, so y == x, identical to the reference branch.
    t = jnp.exp(jnp.minimum(x, 20.0))
    p = t * (t + 2.0)
    y = x * (p / (p + 2.0))
    o_ref[...] = y.astype(o_ref.dtype)


def mish(x: jax.Array, *, block_bytes: int = 2 * 1024 * 1024) -> jax.Array:
    """Elementwise Mish. Accepts any shape/float dtype; returns same shape/dtype."""
    orig_shape = x.shape
    dtype = x.dtype

    flat = x.reshape(-1)
    n = flat.shape[0]

    # Only pad if the element count is not already 128-lane aligned.
    n_pad = pl.cdiv(n, 128) * 128
    padded = n_pad != n
    if padded:
        flat = jnp.pad(flat, (0, n_pad - n))

    # Widest lane-dense last dim that divides the (padded) length.
    lanes = 128
    for cand in (1024, 512, 256, 128):
        if n_pad % cand == 0:
            lanes = cand
            break
    rows = n_pad // lanes
    slab = flat.reshape(rows, lanes)

    # Block sizing: ~2 MiB blocks so in+out double buffers (4x block) stay
    # under v5e's 16 MiB scoped-VMEM default while sitting on the roofline
    # plateau on v6e/v7x.  Block rows are a multiple of 8 (or the full dim).
    itemsize = jnp.dtype(dtype).itemsize
    max_block_rows = max(8, block_bytes // (lanes * itemsize))
    if rows <= max_block_rows:
        block_rows = rows
        # Keep >=2 grid steps when cheaply possible so both v7x TensorCores
        # get work (the grid axis is marked "parallel").
        if rows >= 16 and rows % 2 == 0 and (rows // 2) % 8 == 0:
            block_rows = rows // 2
    else:
        block_rows = max(8, max_block_rows - (max_block_rows % 8))

    grid = (pl.cdiv(rows, block_rows),)  # ragged last block: Pallas masks stores

    out = pl.pallas_call(
        _mish_kernel,
        out_shape=jax.ShapeDtypeStruct((rows, lanes), dtype),
        grid=grid,
        in_specs=[pl.BlockSpec((block_rows, lanes), lambda i: (i, 0))],
        out_specs=pl.BlockSpec((block_rows, lanes), lambda i: (i, 0)),
        compiler_params=pltpu.CompilerParams(
            dimension_semantics=("parallel",),
        ),
    )(slab)

    out_flat = out.reshape(-1)
    if padded:
        out_flat = out_flat[:n]
    return out_flat.reshape(orig_shape)


def _mish_ref(x):
    # Direct transcription of inputs * tanh(F.softplus(inputs)) (threshold=20).
    xf = x.astype(jnp.float32)
    sp = jnp.where(xf > 20.0, xf, jnp.log1p(jnp.exp(jnp.minimum(xf, 20.0))))
    return (xf * jnp.tanh(sp)).astype(x.dtype)


if __name__ == "__main__":
    key = jax.random.PRNGKey(0)
    # NCHW feature map, like a conv activation: batch=2, channels=4, 16x16 spatial.
    x = jax.random.normal(key, (2, 4, 16, 16), dtype=jnp.float32) * 3.0

    y = jax.block_until_ready(mish(x))
    y_ref = _mish_ref(x)

    assert y.shape == x.shape and y.dtype == x.dtype
    assert jnp.allclose(y, y_ref, atol=1e-5, rtol=1e-5), float(
        jnp.max(jnp.abs(y - y_ref))
    )

    print("KERNEL_OK")
</pallas_src>

<mosaic_0001>
module attributes {stable_mosaic.version = 11 : i64} {
  func.func @_mish_kernel(%arg0: i32, %arg1: memref<2x1024xf32, #tpu.memory_space<vmem>>, %arg2: memref<2x1024xf32, #tpu.memory_space<vmem>>) attributes {dimension_semantics = [#tpu.dimension_semantics<parallel>], iteration_bounds = array<i64: 1>, scalar_prefetch = 0 : i64, scratch_operands = 0 : i64, tpu.core_type = #tpu.core_type<tc>, window_params = [{transform_indices = @transform_0, window_bounds = array<i64: 2, 1024>}, {transform_indices = @transform_1, window_bounds = array<i64: 2, 1024>}]} {
    %c0 = arith.constant 0 : index
    %c0_0 = arith.constant 0 : index
    %0 = vector.load %arg1[%c0, %c0_0] : memref<2x1024xf32, #tpu.memory_space<vmem>>, vector<2x1024xf32>
    %cst = arith.constant 2.000000e+01 : f32
    %1 = vector.broadcast %cst : f32 to vector<2x1024xf32>
    %2 = arith.minimumf %0, %1 : vector<2x1024xf32>
    %3 = math.exp %2 : vector<2x1024xf32>
    %cst_1 = arith.constant 2.000000e+00 : f32
    %4 = vector.broadcast %cst_1 : f32 to vector<2x1024xf32>
    %5 = arith.addf %3, %4 : vector<2x1024xf32>
    %6 = arith.mulf %3, %5 : vector<2x1024xf32>
    %cst_2 = arith.constant 2.000000e+00 : f32
    %7 = vector.broadcast %cst_2 : f32 to vector<2x1024xf32>
    %8 = arith.addf %6, %7 : vector<2x1024xf32>
    %9 = arith.divf %6, %8 : vector<2x1024xf32>
    %10 = arith.mulf %0, %9 : vector<2x1024xf32>
    %c0_3 = arith.constant 0 : index
    %c0_4 = arith.constant 0 : index
    %11 = vector.load %arg2[%c0_3, %c0_4] : memref<2x1024xf32, #tpu.memory_space<vmem>>, vector<2x1024xf32>
    tpu.vector_store %arg2[%c0_3, %c0_4], %10 {strides = array<i32>} : memref<2x1024xf32, #tpu.memory_space<vmem>>, vector<2x1024xf32>,
    return
  }
  func.func @transform_0(%arg0: i32) -> (i32, i32) {
    %c0_i32 = arith.constant 0 : i32
    %c0_i32_0 = arith.constant 0 : i32
    return %arg0, %c0_i32 : i32, i32
  }
  func.func @transform_1(%arg0: i32) -> (i32, i32) {
    %c0_i32 = arith.constant 0 : i32
    %c0_i32_0 = arith.constant 0 : i32
    return %arg0, %c0_i32 : i32, i32
  }
}

</mosaic_0001>

<bundles_post_ra>
// kernel: tpu_custom_call.1
= control target key start
LH: loop header
LB: loop body
LE: loop exit
PB: predicated region body
PF: predicated region fallthrough
CT: control target
= control target key end

     0   :  { %6 = vsyncpa [#allocation3], 0  ;;  %s152_s0 = inlined_call_operand.hbm [shape: f32[2,1024], index: 0, kind: input, shape index: {}]   ;;  %s153_s1 = inlined_call_operand.hbm [shape: f32[2,1024], index: 1, kind: output, shape index: {}]  }
   0x1   :  { %7 = vsyncpa [#allocation4], 0  ;;  %s116_s6 = smov [#allocation2]   ;;  %s68_s10 = scalar_lea.hbm %s152_s0, 256 }
   0x2   :  { %s14_s7 = sshll.u32 %s116_s6, 4  ;;  %p69_p0 = scmp.ne.s32.totalorder %s152_s0, %s68_s10  ;;  %s15_s7 = int_to_ptr.vmem [resolvable:$true] %s14_s7 }
   0x3   :  { %p72_p1 = scmp.lt.u32.totalorder %s68_s10, %s152_s0 }
   0x5   :  { %p74_p2 = pnand %p72_p1, %p69_p0 }
   0x7   :  { %77 = shalt.err (!%p74_p2)
}
   0x8   :  { %s78_s15 = scalar_lea.vmem %s15_s7, 256  ;;  %p83_p4 = scmp.lt.s32.totalorder %s15_s7, %s15_s7 }
   0x9   :  { %p79_p3 = scmp.ne.s32.totalorder %s15_s7, %s78_s15  ;;  %p84_p5 = scmp.lt.s32.totalorder %s78_s15, %s78_s15 }
   0xb   :  { %p85_p6 = por %p84_p5, %p83_p4 }
   0xd   :  { %p86_p7 = pnand %p85_p6, %p79_p3 }
   0xf   :  { %89 = shalt.err (!%p86_p7)
}
  0x10   :  { %17 = dma.hbm_to_vmem [thread:$0]  %s152_s0, 256, %s15_s7, [#allocation3]  }
  0x11   :  { %112 = dma.done.wait [#allocation3], 256  }
  0x12   :  { %113 = vsyncadd [#allocation3], 4294967040  ;;  %v21_v0 = vld [vmem:[#allocation2] sm:$0xff]  ;;  %v22_v1 = vld [vmem:[#allocation2 + $0x8] sm:$0xff]  ;;  %s117_s0 = smov [#allocation5]  }
  0x13   :  { %v23_v2 = vmin.f32 %v21_v0, 20.0  ;;  %v24_v3 = vmin.f32 %v22_v1, 20.0  ;;  %s49_s18 = sshll.u32 %s117_s0, 4  ;;  %s50_s18 = int_to_ptr.vmem [resolvable:$true] %s49_s18 }
  0x14   :  { %s90_s19 = scalar_lea.vmem %s50_s18, 256  ;;  %p95_p9 = scmp.lt.s32.totalorder %s50_s18, %s50_s18 }
  0x15   :  { %v25_v4 = vmul.f32 1.442695, %v23_v2  ;;  %v27_v5 = vmul.f32 1.442695, %v24_v3  ;;  %p91_p8 = scmp.ne.s32.totalorder %s50_s18, %s90_s19  ;;  %p96_p10 = scmp.lt.s32.totalorder %s90_s19, %s90_s19 }
  0x17   :  { %60 = vpow2.f32 %v25_v4  ;;  %p97_p11 = por %p96_p10, %p95_p9 }
  0x18   :  { %62 = vpow2.f32 %v27_v5 }
  0x19   :  { %p98_p12 = pnand %p97_p11, %p91_p8 }
  0x21   :  { %v61_v6 = vpop.eup %60 }
  0x22   :  { %v63_v7 = vpop.eup %62  ;;  %v29_v8 = vadd.f32 2.0, %v61_v6 }
  0x23   :  { %v30_v9 = vadd.f32 2.0, %v63_v7 }
  0x24   :  { %v31_v10 = vmul.f32 %v61_v6, %v29_v8 }
  0x25   :  { %v32_v11 = vmul.f32 %v63_v7, %v30_v9 }
  0x26   :  { %v33_v12 = vadd.f32 2.0, %v31_v10 }
  0x27   :  { %v34_v13 = vadd.f32 2.0, %v32_v11 }
  0x28   :  { %64 = vrcp.f32 %v33_v12 }
  0x29   :  { %66 = vrcp.f32 %v34_v13 }
  0x32   :  { %v65_v14 = vpop.eup %64 }
  0x33   :  { %v67_v15 = vpop.eup %66  ;;  %v36_v16 = vmul.f32 %v65_v14, %v31_v10 }
  0x34   :  { %v38_v17 = vmul.f32 %v67_v15, %v32_v11 }
  0x35   :  { %v39_v18 = vmul.f32 %v36_v16, %v21_v0 }
  0x36   :  { %v40_v19 = vmul.f32 %v38_v17, %v22_v1 }
  0x37   :  { %41 = vst [vmem:[#allocation5] sm:$0xff] %v39_v18 }
  0x38   :  { %42 = vst [vmem:[#allocation5 + $0x8] sm:$0xff] %v40_v19 }
  0x39   :  { %101 = shalt.err (!%p98_p12)
}
  0x3a   :  { %s102_s22 = scalar_lea.hbm %s153_s1, 256 }
  0x3b   :  { %p103_p13 = scmp.ne.s32.totalorder %s153_s1, %s102_s22  ;;  %p106_p0 = scmp.lt.u32.totalorder %s102_s22, %s153_s1 }
  0x3d   :  { %p108_p1 = pnand %p106_p0, %p103_p13 }
  0x3f   :  { %111 = shalt.err (!%p108_p1)
}
  0x40   :  { %52 = dma.vmem_to_hbm [thread:$0]  %s50_s18, 256, %s153_s1, [#allocation4]  }
  0x41   :  { %114 = dma.done.wait [#allocation4], 256  }
  0x42   :  { %115 = vsyncadd [#allocation4], 4294967040 }
  0x43   :  { %56 = vsyncpa [#allocation3], 1 }
  0x44   :  { %57 = vsyncpa [#allocation4], 1 }

</bundles_post_ra>
